<compile_context>
chip_gen: v7x
topology: tpu7x:2x2x1
jax: 0.10.0
libtpu: 0.0.40
codegen_flags: <defaults>
</compile_context>

<pallas_src>
import math

import jax
import jax.numpy as jnp
from jax import lax
from jax.experimental import pallas as pl
from jax.experimental.pallas import tpu as pltpu


def _cdiv(a, b):
    return (a + b - 1) // b


def _round_up(a, b):
    return _cdiv(a, b) * b


_CHUNK_ROWS = 256  # rows per inner fold step (keeps BCE intermediates ~chunk-sized)


def _pick_lanes(shape):
    """Choose a lane-dense 2-D view (rows, lanes).  Returns (lanes, pad_elems)."""
    total = math.prod(shape)
    w = shape[-1]
    # (a) Pure leading-dim collapse: reshape is layout-trivial when the minor dims
    #     already tile cleanly; at worst it is no more expensive than any other view.
    if w % 128 == 0 and w <= 4096 and total // w >= 8:
        return w, 0
    # (b) Any lane-dense divisor of the element count -> no padding at all.
    for lanes in (512, 256, 1024, 128, 2048, 4096):
        if total % lanes == 0 and total // lanes >= 8:
            return lanes, 0
    for lanes in (512, 256, 1024, 128):
        if total % lanes == 0:
            return lanes, 0
    # (c) Fallback (total not divisible by 128): minimal pad (< lanes elements) to
    #     complete the last row; padded elements are masked out inside the kernel.
    lanes = 512
    return lanes, _round_up(total, lanes) - total


def _select_tuning():
    """(per-input block byte budget, vmem_limit_bytes) tuned to the chip's VMEM."""
    block_budget, vmem_limit = 2 * 1024 * 1024, 32 * 1024 * 1024  # safe on v7x (64 MiB)
    try:
        if pltpu.get_tpu_info().vmem_capacity_bytes >= 100 * 1024 * 1024:
            # v5e / v6e: 128 MiB physical VMEM -> bigger blocks amortize the
            # ~0.35 us/step grid overhead.
            block_budget, vmem_limit = 4 * 1024 * 1024, 64 * 1024 * 1024
    except Exception:
        pass
    return block_budget, vmem_limit


def _make_kernel(*, lanes, row_tile, chunk_rows, acc_rows, n_chunks, n_i, total):
    """Kernel accumulating the (positive) per-lane BCE sums into a resident tile."""
    block_elems = row_tile * lanes

    def kernel(p_ref, t_ref, o_ref):
        c = pl.program_id(0)   # 'parallel' axis (megacore / v7x dual-TC)
        i = pl.program_id(1)   # 'arbitrary' reduction axis

        @pl.when(i == 0)
        def _():
            o_ref[...] = jnp.zeros_like(o_ref)

        linear_b = c * n_i + i
        # Number of *true* (unpadded) elements covered by this block.
        ve = total - linear_b * block_elems

        def fold(mask_tail):
            def chunk(k, acc):
                r0 = pl.multiple_of(k * chunk_rows, chunk_rows)
                p = p_ref[pl.ds(r0, chunk_rows), :]
                t = t_ref[pl.ds(r0, chunk_rows), :]
                if p.dtype != jnp.float32:
                    p = p.astype(jnp.float32)
                if t.dtype != jnp.float32:
                    t = t.astype(jnp.float32)
                # F.binary_cross_entropy clamps the log terms at -100.
                log_p = jnp.maximum(jnp.log(p), -100.0)
                log_1mp = jnp.maximum(jnp.log(1.0 - p), -100.0)
                # Positive BCE term: t*log(p) + (1-t)*log(1-p); the leading minus
                # sign is folded into the wrapper's final scale.
                bce = log_1mp + t * (log_p - log_1mp)
                if mask_tail:
                    row_id = lax.broadcasted_iota(jnp.int32, (chunk_rows, lanes), 0)
                    lane_id = lax.broadcasted_iota(jnp.int32, (chunk_rows, lanes), 1)
                    elem_id = (k * chunk_rows + row_id) * lanes + lane_id
                    bce = jnp.where(elem_id < ve, bce, 0.0)
                # Fold sublane groups with VPU adds only (minor (acc_rows, lanes)
                # dims untouched -> layout-trivial reshape).
                part = bce.reshape(chunk_rows // acc_rows, acc_rows, lanes).sum(axis=0)
                return acc + part

            acc = lax.fori_loop(0, n_chunks, chunk,
                                jnp.zeros((acc_rows, lanes), jnp.float32),
                                unroll=True)
            o_ref[...] += acc[None]

        # Fast path: block fully inside the valid range -> no masking ops.
        @pl.when(ve >= block_elems)
        def _():
            fold(False)

        # Ragged tail block: mask out-of-range elements in-kernel (replaces the
        # full-array jnp.pad, which cost an extra HBM round trip).
        @pl.when(jnp.logical_and(ve > 0, ve < block_elems))
        def _():
            fold(True)

    return kernel


@jax.jit
def channelwise_bce_loss(preds, target):
    """preds, target: (B, C, D, H, W); preds are probabilities in (0, 1)."""
    assert preds.shape == target.shape and preds.ndim == 5
    total = math.prod(preds.shape)
    assert 0 < total < 2 ** 31 - 2 ** 25  # int32 element indexing in the kernel

    lanes, pad = _pick_lanes(preds.shape)
    block_budget, vmem_limit = _select_tuning()

    p2, t2 = preds, target
    if pad:
        # Rare shapes only (total not divisible by 128).  Padded values are masked
        # out inside the kernel; the divisor below stays `total`.
        # TODO(synk): this path still pays one extra HBM copy for the pad.
        p2 = jnp.pad(p2.reshape(-1), (0, pad), constant_values=1.0)
        t2 = jnp.pad(t2.reshape(-1), (0, pad), constant_values=1.0)
    rows = (total + pad) // lanes
    p2 = p2.reshape(rows, lanes)
    t2 = t2.reshape(rows, lanes)

    n_cores = 2  # leading 'parallel' axis: both TCs on v7x; harmless sequential elsewhere

    # Rows per block, bounded by the per-chip block byte budget.
    itemsize = jnp.dtype(preds.dtype).itemsize
    max_row_tile = max(block_budget // (lanes * itemsize), 8)
    if max_row_tile >= _CHUNK_ROWS:
        max_row_tile = (max_row_tile // _CHUNK_ROWS) * _CHUNK_ROWS
    else:
        max_row_tile = (max_row_tile // 8) * 8

    if rows < 8:
        row_tile = rows
        chunk_rows = rows
    else:
        row_tile = min(max_row_tile, _round_up(_cdiv(rows, n_cores), 8))
        if row_tile >= _CHUNK_ROWS:
            row_tile = min(_round_up(row_tile, _CHUNK_ROWS), max_row_tile)
            chunk_rows = _CHUNK_ROWS
        else:
            chunk_rows = row_tile
    acc_rows = min(8, row_tile)
    n_chunks = row_tile // chunk_rows
    blocks_total = _cdiv(rows, row_tile)
    n_i = _cdiv(blocks_total, n_cores)

    kernel = _make_kernel(lanes=lanes, row_tile=row_tile, chunk_rows=chunk_rows,
                          acc_rows=acc_rows, n_chunks=n_chunks, n_i=n_i, total=total)

    def in_map(c, i):
        # Clamp fully-out-of-range steps onto the last block; their contribution
        # is gated off in the kernel via `ve <= 0`.
        return (jnp.minimum(c * n_i + i, blocks_total - 1), 0)

    partials = pl.pallas_call(
        kernel,
        out_shape=jax.ShapeDtypeStruct((n_cores, acc_rows, lanes), jnp.float32),
        grid_spec=pltpu.PrefetchScalarGridSpec(
            num_scalar_prefetch=0,
            grid=(n_cores, n_i),
            in_specs=[
                pl.BlockSpec((row_tile, lanes), in_map),
                pl.BlockSpec((row_tile, lanes), in_map),
            ],
            # Output block index depends only on the parallel axis -> the
            # (acc_rows, lanes) accumulator stays VMEM-resident across the whole
            # reduction axis; lane-dense (>=128) for unmasked stores.
            out_specs=pl.BlockSpec((1, acc_rows, lanes), lambda c, i: (c, 0, 0)),
        ),
        compiler_params=pltpu.CompilerParams(
            dimension_semantics=("parallel", "arbitrary"),
            vmem_limit_bytes=vmem_limit,
        ),
    )(p2, t2)

    # Tiny final reduce + (negated) mean scale; negation folded here saves one
    # VPU op per element in the kernel.
    return jnp.sum(partials) * (-1.0 / float(total))


def _reference_loss(preds, target):
    # Pure-JAX reference mirroring the PyTorch module (incl. the -100 clamp).
    log_p = jnp.maximum(jnp.log(preds), -100.0)
    log_1mp = jnp.maximum(jnp.log(1.0 - preds), -100.0)
    bce = -(target * log_p + (1.0 - target) * log_1mp)
    return bce.mean(axis=(2, 3, 4)).mean(axis=1).mean()


def _check(shape, key):
    k1, k2 = jax.random.split(key)
    preds = jax.nn.sigmoid(jax.random.normal(k1, shape, jnp.float32))
    target = jax.random.uniform(k2, shape, jnp.float32)
    loss = jax.block_until_ready(channelwise_bce_loss(preds, target))
    ref = jax.block_until_ready(_reference_loss(preds, target))
    assert jnp.allclose(loss, ref, atol=1e-5, rtol=1e-5), (shape, loss, ref)


if __name__ == "__main__":
    key = jax.random.PRNGKey(0)
    k0, k1, k2 = jax.random.split(key, 3)

    # Primary small 5-D shape consistent with mean(dim=(2,3,4)): (B, C, D, H, W)
    _check((2, 4, 4, 8, 8), k0)
    # Ragged-tail block path (row count not a multiple of the row tile).
    _check((2, 3, 5, 8, 8), k1)
    # W % 128 == 0 collapse path with multi-chunk inner fold.
    _check((2, 4, 8, 32, 128), k2)

    print("KERNEL_OK")
</pallas_src>

<mosaic_0001>
module attributes {stable_mosaic.version = 11 : i64} {
  func.func @kernel(%arg0: i32, %arg1: i32, %arg2: memref<8x256xf32, #tpu.memory_space<vmem>>, %arg3: memref<8x256xf32, #tpu.memory_space<vmem>>, %arg4: memref<1x8x256xf32, #tpu.memory_space<vmem>>) attributes {dimension_semantics = [#tpu.dimension_semantics<parallel>, #tpu.dimension_semantics<arbitrary>], iteration_bounds = array<i64: 2, 1>, scalar_prefetch = 0 : i64, scratch_operands = 0 : i64, tpu.core_type = #tpu.core_type<tc>, window_params = [{transform_indices = @transform_0, window_bounds = array<i64: 8, 256>}, {transform_indices = @transform_1, window_bounds = array<i64: 8, 256>}, {transform_indices = @transform_2, window_bounds = array<i64: 1, 8, 256>}]} {
    %c0_i32 = arith.constant 0 : i32
    %0 = arith.cmpi eq, %arg1, %c0_i32 : i32
    %1 = arith.extui %0 : i1 to i32
    %c0_i32_0 = arith.constant 0 : i32
    %2 = arith.cmpi ne, %1, %c0_i32_0 : i32
    scf.if %2 {
      %cst = arith.constant 0.000000e+00 : f32
      %15 = vector.broadcast %cst : f32 to vector<1x8x256xf32>
      %c0 = arith.constant 0 : index
      %c0_7 = arith.constant 0 : index
      %c0_8 = arith.constant 0 : index
      %16 = vector.load %arg4[%c0, %c0_7, %c0_8] : memref<1x8x256xf32, #tpu.memory_space<vmem>>, vector<1x8x256xf32>
      tpu.vector_store %arg4[%c0, %c0_7, %c0_8], %15 {strides = array<i32>} : memref<1x8x256xf32, #tpu.memory_space<vmem>>, vector<1x8x256xf32>,
    } else {
    }
    %c1_i32 = arith.constant 1 : i32
    %3 = arith.muli %arg0, %c1_i32 : i32
    %4 = arith.addi %3, %arg1 : i32
    %c2048_i32 = arith.constant 2048 : i32
    %5 = arith.muli %4, %c2048_i32 : i32
    %c2048_i32_1 = arith.constant 2048 : i32
    %6 = arith.subi %c2048_i32_1, %5 : i32
    %c2048_i32_2 = arith.constant 2048 : i32
    %7 = arith.cmpi sge, %6, %c2048_i32_2 : i32
    %8 = arith.extui %7 : i1 to i32
    %c0_i32_3 = arith.constant 0 : i32
    %9 = arith.cmpi ne, %8, %c0_i32_3 : i32
    scf.if %9 {
      %cst = arith.constant 0.000000e+00 : f32
      %15 = vector.broadcast %cst : f32 to vector<8x256xf32>
      %c0_i32_7 = arith.constant 0 : i32
      %c8_i32 = arith.constant 8 : i32
      %16 = arith.muli %c0_i32_7, %c8_i32 : i32
      %17 = tpu.assume_multiple %16, 8 : i32
      %18 = arith.index_cast %17 : i32 to index
      %c0 = arith.constant 0 : index
      %19 = vector.load %arg2[%18, %c0] : memref<8x256xf32, #tpu.memory_space<vmem>>, vector<8x256xf32>
      %20 = arith.index_cast %17 : i32 to index
      %c0_8 = arith.constant 0 : index
      %21 = vector.load %arg3[%20, %c0_8] : memref<8x256xf32, #tpu.memory_space<vmem>>, vector<8x256xf32>
      %22 = math.log %19 : vector<8x256xf32>
      %cst_9 = arith.constant -1.000000e+02 : f32
      %23 = vector.broadcast %cst_9 : f32 to vector<8x256xf32>
      %24 = arith.maximumf %22, %23 : vector<8x256xf32>
      %cst_10 = arith.constant 1.000000e+00 : f32
      %25 = vector.broadcast %cst_10 : f32 to vector<8x256xf32>
      %26 = arith.subf %25, %19 : vector<8x256xf32>
      %27 = math.log %26 : vector<8x256xf32>
      %cst_11 = arith.constant -1.000000e+02 : f32
      %28 = vector.broadcast %cst_11 : f32 to vector<8x256xf32>
      %29 = arith.maximumf %27, %28 : vector<8x256xf32>
      %30 = arith.subf %24, %29 : vector<8x256xf32>
      %31 = arith.mulf %21, %30 : vector<8x256xf32>
      %32 = arith.addf %29, %31 : vector<8x256xf32>
      %33 = vector.shape_cast %32 : vector<8x256xf32> to vector<1x8x256xf32>
      %cst_12 = arith.constant dense<0.000000e+00> : vector<8x256xf32>
      %34 = vector.multi_reduction <add>, %33, %cst_12 [0] : vector<1x8x256xf32> to vector<8x256xf32>
      %35 = arith.addf %15, %34 : vector<8x256xf32>
      %c1_i32_13 = arith.constant 1 : i32
      %c0_14 = arith.constant 0 : index
      %c0_15 = arith.constant 0 : index
      %c0_16 = arith.constant 0 : index
      %36 = vector.load %arg4[%c0_14, %c0_15, %c0_16] : memref<1x8x256xf32, #tpu.memory_space<vmem>>, vector<1x8x256xf32>
      %37 = vector.shape_cast %35 : vector<8x256xf32> to vector<1x8x256xf32>
      %38 = arith.addf %36, %37 : vector<1x8x256xf32>
      %c0_17 = arith.constant 0 : index
      %c0_18 = arith.constant 0 : index
      %c0_19 = arith.constant 0 : index
      %39 = vector.load %arg4[%c0_17, %c0_18, %c0_19] : memref<1x8x256xf32, #tpu.memory_space<vmem>>, vector<1x8x256xf32>
      tpu.vector_store %arg4[%c0_17, %c0_18, %c0_19], %38 {strides = array<i32>} : memref<1x8x256xf32, #tpu.memory_space<vmem>>, vector<1x8x256xf32>,
    } else {
    }
    %c0_i32_4 = arith.constant 0 : i32
    %10 = arith.cmpi sgt, %6, %c0_i32_4 : i32
    %c2048_i32_5 = arith.constant 2048 : i32
    %11 = arith.cmpi slt, %6, %c2048_i32_5 : i32
    %12 = arith.andi %10, %11 : i1
    %13 = arith.extui %12 : i1 to i32
    %c0_i32_6 = arith.constant 0 : i32
    %14 = arith.cmpi ne, %13, %c0_i32_6 : i32
    scf.if %14 {
      %cst = arith.constant 0.000000e+00 : f32
      %15 = vector.broadcast %cst : f32 to vector<8x256xf32>
      %c0_i32_7 = arith.constant 0 : i32
      %c8_i32 = arith.constant 8 : i32
      %16 = arith.muli %c0_i32_7, %c8_i32 : i32
      %17 = tpu.assume_multiple %16, 8 : i32
      %18 = arith.index_cast %17 : i32 to index
      %c0 = arith.constant 0 : index
      %19 = vector.load %arg2[%18, %c0] : memref<8x256xf32, #tpu.memory_space<vmem>>, vector<8x256xf32>
      %20 = arith.index_cast %17 : i32 to index
      %c0_8 = arith.constant 0 : index
      %21 = vector.load %arg3[%20, %c0_8] : memref<8x256xf32, #tpu.memory_space<vmem>>, vector<8x256xf32>
      %22 = math.log %19 : vector<8x256xf32>
      %cst_9 = arith.constant -1.000000e+02 : f32
      %23 = vector.broadcast %cst_9 : f32 to vector<8x256xf32>
      %24 = arith.maximumf %22, %23 : vector<8x256xf32>
      %cst_10 = arith.constant 1.000000e+00 : f32
      %25 = vector.broadcast %cst_10 : f32 to vector<8x256xf32>
      %26 = arith.subf %25, %19 : vector<8x256xf32>
      %27 = math.log %26 : vector<8x256xf32>
      %cst_11 = arith.constant -1.000000e+02 : f32
      %28 = vector.broadcast %cst_11 : f32 to vector<8x256xf32>
      %29 = arith.maximumf %27, %28 : vector<8x256xf32>
      %30 = arith.subf %24, %29 : vector<8x256xf32>
      %31 = arith.mulf %21, %30 : vector<8x256xf32>
      %32 = arith.addf %29, %31 : vector<8x256xf32>
      %33 = tpu.iota {dimensions = array<i32: 0>} : vector<8x256xi32>
      %34 = tpu.iota {dimensions = array<i32: 1>} : vector<8x256xi32>
      %c8_i32_12 = arith.constant 8 : i32
      %35 = arith.muli %c0_i32_7, %c8_i32_12 : i32
      %36 = vector.broadcast %35 : i32 to vector<8x256xi32>
      %37 = arith.addi %36, %33 : vector<8x256xi32>
      %c256_i32 = arith.constant 256 : i32
      %38 = vector.broadcast %c256_i32 : i32 to vector<8x256xi32>
      %39 = arith.muli %37, %38 : vector<8x256xi32>
      %40 = arith.addi %39, %34 : vector<8x256xi32>
      %41 = vector.broadcast %6 : i32 to vector<8x256xi32>
      %42 = arith.cmpi slt, %40, %41 : vector<8x256xi32>
      %cst_13 = arith.constant 0.000000e+00 : f32
      %43 = vector.broadcast %cst_13 : f32 to vector<8x256xf32>
      %44 = arith.select %42, %32, %43 : vector<8x256xi1>, vector<8x256xf32>
      %45 = vector.shape_cast %44 : vector<8x256xf32> to vector<1x8x256xf32>
      %cst_14 = arith.constant dense<0.000000e+00> : vector<8x256xf32>
      %46 = vector.multi_reduction <add>, %45, %cst_14 [0] : vector<1x8x256xf32> to vector<8x256xf32>
      %47 = arith.addf %15, %46 : vector<8x256xf32>
      %c1_i32_15 = arith.constant 1 : i32
      %c0_16 = arith.constant 0 : index
      %c0_17 = arith.constant 0 : index
      %c0_18 = arith.constant 0 : index
      %48 = vector.load %arg4[%c0_16, %c0_17, %c0_18] : memref<1x8x256xf32, #tpu.memory_space<vmem>>, vector<1x8x256xf32>
      %49 = vector.shape_cast %47 : vector<8x256xf32> to vector<1x8x256xf32>
      %50 = arith.addf %48, %49 : vector<1x8x256xf32>
      %c0_19 = arith.constant 0 : index
      %c0_20 = arith.constant 0 : index
      %c0_21 = arith.constant 0 : index
      %51 = vector.load %arg4[%c0_19, %c0_20, %c0_21] : memref<1x8x256xf32, #tpu.memory_space<vmem>>, vector<1x8x256xf32>
      tpu.vector_store %arg4[%c0_19, %c0_20, %c0_21], %50 {strides = array<i32>} : memref<1x8x256xf32, #tpu.memory_space<vmem>>, vector<1x8x256xf32>,
    } else {
    }
    return
  }
  func.func @transform_0(%arg0: i32, %arg1: i32) -> (i32, i32) {
    %c1_i32 = arith.constant 1 : i32
    %0 = arith.muli %arg0, %c1_i32 : i32
    %1 = arith.addi %0, %arg1 : i32
    %c0_i32 = arith.constant 0 : i32
    %2 = arith.minsi %1, %c0_i32 : i32
    %c0_i32_0 = arith.constant 0 : i32
    %c0_i32_1 = arith.constant 0 : i32
    return %2, %c0_i32_0 : i32, i32
  }
  func.func @transform_1(%arg0: i32, %arg1: i32) -> (i32, i32) {
    %c1_i32 = arith.constant 1 : i32
    %0 = arith.muli %arg0, %c1_i32 : i32
    %1 = arith.addi %0, %arg1 : i32
    %c0_i32 = arith.constant 0 : i32
    %2 = arith.minsi %1, %c0_i32 : i32
    %c0_i32_0 = arith.constant 0 : i32
    %c0_i32_1 = arith.constant 0 : i32
    return %2, %c0_i32_0 : i32, i32
  }
  func.func @transform_2(%arg0: i32, %arg1: i32) -> (i32, i32, i32) {
    %c0_i32 = arith.constant 0 : i32
    %c0_i32_0 = arith.constant 0 : i32
    %c0_i32_1 = arith.constant 0 : i32
    return %arg0, %c0_i32, %c0_i32_0 : i32, i32, i32
  }
}

</mosaic_0001>

<bundles_post_ra>
// kernel: channelwise_bce_loss.1
= control target key start
LH: loop header
LB: loop body
LE: loop exit
PB: predicated region body
PF: predicated region fallthrough
CT: control target
= control target key end

     0   :  { %s508_s9 = smov 0   ;;  %s510_s10 = smov 0   ;;  %s577_s0 = inlined_call_operand.vmem [shape: f32[8,256], index: 0, kind: input, shape index: {}]   ;;  %s578_s1 = inlined_call_operand.vmem [shape: f32[8,256], index: 1, kind: input, shape index: {}]   ;;  %s579_s2 = inlined_call_operand.vmem [shape: f32[2,8,256], index: 2, kind: output, shape index: {}]  }
   0x1   :  { %s512_s11 = smov 0  }
   0x2 LB: > { %s24_s12 = sadd.s32 1, %s486_s10  ;;  %p407_p0 = scmp.ge.s32.totalorder %s490_s11, 1  ;;  %s490_s11 = sphi %s512_s11, %s12_s11   ;;  %s486_s10 = sphi %s510_s10, %s581_s10   ;;  %s482_s9 = sphi %s508_s9, %s580_s9  }
   0x3   : > { %p26_p1 = scmp.ge.s32.totalorder %s24_s12, 2  ;;  %p158_p2 = scmp.lt.s32.totalorder %s490_s11, 3 }
   0x5   : > { %s583_s12 = smov (%p26_p1, %s24_s12), 0  ;;  %p159_p3 = pnand %p407_p0, %p158_p2 }
   0x6   : > { %p192_p4 = scmp.lt.s32.totalorder (!%p159_p3), %s482_s9, 0  ;;  %p213_p5 = scmp.lt.s32.totalorder (!%p159_p3), %s482_s9, 1  ;;  %v492_v0 = vmov (!%p159_p3), 0.0  }
   0x7   : > { %162 = sbr.rel (%p159_p3) target bundleno = 79 (0x4f), region = 28  ;;  %s420_s13 = sshll.u32 (!%p159_p3), %s482_s9, 11 }
   0x8   : > { %s526_s16 = ssub.s32 (!%p159_p3), 2048, %s420_s13 }
   0x9   : > { %p421_p6 = scmp.lt.s32.totalorder (!%p159_p3), %s526_s16, 2048 }
   0xe   : > { %s193_s14 = scalar_select %p192_p4, %s482_s9, 0 }
   0xf   : > { %s585_s9 = smov (!%p213_p5, %s482_s9), 1  ;;  %230 = sbr.rel (%p421_p6) target bundleno = 47 (0x2f), region = 36 }
  0x10   : > { %s587_s14 = smov (!%p192_p4, %s193_s14), 0  ;;  %s426_s15 = sshll.u32 %s585_s9, 4 }
  0x11   : > { %s424_s17 = sshll.u32 %s587_s14, 4  ;;  %s531_s20 = scalar_lea.vmem %s579_s2, %s426_s15 }
  0x12   : > { %s536_s23 = scalar_lea.vmem %s577_s0, %s424_s17  ;;  %s541_s26 = scalar_lea.vmem %s578_s1, %s424_s17  ;;  %222 = vst [vmem:[%s531_s20] sm:$0xff] %v492_v0  ;;  %223 = vst [vmem:[%s531_s20 + $0x8] sm:$0xff] %v492_v0 }
  0x13   : > { %v234_v1 = vld [vmem:[%s536_s23] sm:$0xff] (!%p421_p6)  ;;  %v235_v3 = vld [vmem:[%s536_s23 + $0x8] sm:$0xff] (!%p421_p6) }
  0x14   : > { %452 = vlog2.f32 (!%p421_p6), %v234_v1  ;;  %v246_v2 = vsub.f32 (!%p421_p6), 1.0, %v234_v1  ;;  %v247_v4 = vsub.f32 (!%p421_p6), 1.0, %v235_v3  ;;  %v238_v16 = vld [vmem:[%s541_s26] sm:$0xff] (!%p421_p6)  ;;  %v239_v19 = vld [vmem:[%s541_s26 + $0x8] sm:$0xff] (!%p421_p6) }
  0x15   : > { %454 = vlog2.f32 (!%p421_p6), %v235_v3 }
  0x16   : > { %456 = vlog2.f32 %v246_v2 }
  0x17   : > { %458 = vlog2.f32 %v247_v4 }
  0x19   : > { %v264_v22 = vld [vmem:[%s531_s20] sm:$0xff]  ;;  %v265_v25 = vld [vmem:[%s531_s20 + $0x8] sm:$0xff] }
  0x1e   : > { %v453_v5 = vpop.eup %452 }
  0x1f   : > { %v455_v6 = vpop.eup %454  ;;  %v241_v7 = vmul.f32 0.6931472, %v453_v5 }
  0x20   : > { %v457_v8 = vpop.eup %456  ;;  %v243_v9 = vmul.f32 0.6931472, %v455_v6 }
  0x21   : > { %v459_v10 = vpop.eup %458  ;;  %v244_v11 = vmax.f32 %v241_v7, -100.0  ;;  %v249_v12 = vmul.f32 0.6931472, %v457_v8 }
  0x22   : > { %v245_v13 = vmax.f32 %v243_v9, -100.0  ;;  %v251_v14 = vmul.f32 0.6931472, %v459_v10 }
  0x23   : > { %v252_v15 = vmax.f32 %v249_v12, -100.0 }
  0x24   : > { %v253_v17 = vmax.f32 %v251_v14, -100.0 }
  0x25   : > { %v254_v18 = vsub.f32 %v244_v11, %v252_v15 }
  0x26   : > { %v255_v20 = vsub.f32 %v245_v13, %v253_v17 }
  0x27   : > { %v256_v21 = vmul.f32 %v254_v18, %v238_v16 }
  0x28   : > { %v257_v23 = vmul.f32 %v255_v20, %v239_v19 }
  0x29   : > { %v258_v24 = vadd.f32 %v256_v21, %v252_v15 }
  0x2a   : > { %v259_v26 = vadd.f32 %v257_v23, %v253_v17 }
  0x2b   : > { %v266_v27 = vadd.f32 %v264_v22, %v258_v24 }
  0x2c   : > { %v267_v28 = vadd.f32 %v265_v25, %v259_v26 }
  0x2d   : > { %268 = vst [vmem:[%s531_s20] sm:$0xff] %v266_v27 }
  0x2e   : > { %269 = vst [vmem:[%s531_s20 + $0x8] sm:$0xff] %v267_v28 }
  0x2f PF: > { %p270_p7 = scmp.gt.s32.totalorder %s526_s16, 0 }
  0x31   : > { %p272_p8 = pnand %p421_p6, %p270_p7 }
  0x32   : > { %v279_v29 = vld [vmem:[%s536_s23] sm:$0xff] (!%p272_p8)  ;;  %v280_v31 = vld [vmem:[%s536_s23 + $0x8] sm:$0xff] (!%p272_p8)  ;;  %v305_v33 = vlaneseq (!%p272_p8)  ;;  %v313_v53 = vstv (!%p272_p8), %s526_s16 }
  0x33   : > { %275 = sbr.rel (%p272_p8) target bundleno = 79 (0x4f), region = 40  ;;  %460 = vlog2.f32 (!%p272_p8), %v279_v29  ;;  %v291_v30 = vsub.f32 (!%p272_p8), 1.0, %v279_v29  ;;  %v292_v32 = vsub.f32 (!%p272_p8), 1.0, %v280_v31  ;;  %v283_v49 = vld [vmem:[%s541_s26] sm:$0xff] (!%p272_p8)  ;;  %v284_v54 = vld [vmem:[%s541_s26 + $0x8] sm:$0xff] (!%p272_p8) }
  0x34   : > { %462 = vlog2.f32 (!%p272_p8), %v280_v31  ;;  %v306_v34 = vshrl.u32 (!%p272_p8), %v305_v33, 7  ;;  %v308_v35 = vand.u32 (!%p272_p8), 127, %v305_v33  ;;  %v322_v60 = vld [vmem:[%s531_s20] sm:$0xff] (!%p272_p8) }
  0x35   : > { %464 = vlog2.f32 (!%p272_p8), %v291_v30  ;;  %v323_v62 = vld [vmem:[%s531_s20 + $0x8] sm:$0xff] (!%p272_p8) }
  0x36   : > { %466 = vlog2.f32 (!%p272_p8), %v292_v32  ;;  %v310_v40 = vmul.u32 (!%p272_p8), 256, %v306_v34  ;;  %v309_v45 = vadd.s32 (!%p272_p8), 128, %v308_v35 }
  0x38   : > { %v311_v50 = vadd.s32 (!%p272_p8), %v310_v40, %v308_v35  ;;  %v312_v55 = vadd.s32 (!%p272_p8), %v310_v40, %v309_v45 }
  0x3a   : > { %vm314_vm0 = vcmp.lt.s32.totalorder %v311_v50, %v313_v53  ;;  %vm315_vm1 = vcmp.lt.s32.totalorder %v312_v55, %v313_v53 }
  0x3d   : > { %v461_v36 = vpop.eup %460 }
  0x3e   : > { %v463_v37 = vpop.eup %462  ;;  %v286_v38 = vmul.f32 0.6931472, %v461_v36 }
  0x3f   : > { %v465_v39 = vpop.eup %464  ;;  %v288_v41 = vmul.f32 0.6931472, %v463_v37 }
  0x40   : > { %v467_v42 = vpop.eup %466  ;;  %v289_v43 = vmax.f32 %v286_v38, -100.0  ;;  %v294_v44 = vmul.f32 0.6931472, %v465_v39 }
  0x41   : > { %v290_v46 = vmax.f32 %v288_v41, -100.0  ;;  %v296_v47 = vmul.f32 0.6931472, %v467_v42 }
  0x42   : > { %v297_v48 = vmax.f32 %v294_v44, -100.0 }
  0x43   : > { %v298_v51 = vmax.f32 %v296_v47, -100.0 }
  0x44   : > { %v299_v52 = vsub.f32 %v289_v43, %v297_v48 }
  0x45   : > { %v300_v56 = vsub.f32 %v290_v46, %v298_v51 }
  0x46   : > { %v301_v57 = vmul.f32 %v299_v52, %v283_v49 }
  0x47   : > { %v302_v58 = vmul.f32 %v300_v56, %v284_v54 }
  0x48   : > { %v303_v59 = vadd.f32 %v301_v57, %v297_v48 }
  0x49   : > { %v304_v61 = vadd.f32 %v302_v58, %v298_v51 }
  0x4a   : > { %v316_v63 = vsel %vm314_vm0, %v303_v59, 0.0 }
  0x4b   : > { %v324_v0 = vadd.f32 %v322_v60, %v316_v63  ;;  %v317_v1 = vsel %vm315_vm1, %v304_v61, 0.0 }
  0x4c   : > { %v325_v2 = vadd.f32 %v323_v62, %v317_v1 }
  0x4d   : > { %326 = vst [vmem:[%s531_s20] sm:$0xff] %v324_v0 }
  0x4e   : > { %327 = vst [vmem:[%s531_s20 + $0x8] sm:$0xff] %v325_v2 }
  0x4f PF: > { %s12_s11 = sadd.s32 1, %s490_s11   ;;  %s580_s9 = smov %s486_s10 }
  0x50   : > { %p9_p9 = scmp.ge.s32.totalorder %s12_s11, 4   ;;  %s581_s10 = smov %s583_s12 }
  0x52   :  { %11 = sbr.rel (!%p9_p9) target bundleno = 2 (0x2), region = 77 }

</bundles_post_ra>
